<compile_context>
chip_gen: v5e
topology: v5e:2x2
jax: 0.10.0
libtpu: 0.0.40
codegen_flags: <defaults>
</compile_context>

<pallas_src>
import functools

import jax
import jax.numpy as jnp
from jax.experimental import pallas as pl
from jax.experimental.pallas import tpu as pltpu


def _round_up(x: int, m: int) -> int:
    return ((x + m - 1) // m) * m


# ---------------------------------------------------------------------------
# Kernels
# ---------------------------------------------------------------------------
def _logsoftmax_epilogue(acc_ref, b_ref, o_ref):
    """Bias add + max-shifted log-softmax, entirely in f32."""
    logits = acc_ref[...] + b_ref[...]              # padded labels carry -1e30 bias
    m = jnp.max(logits, axis=-1, keepdims=True)
    shifted = logits - m
    lse = jnp.log(jnp.sum(jnp.exp(shifted), axis=-1, keepdims=True))
    o_ref[...] = (shifted - lse).astype(o_ref.dtype)


def _bow_kernel_streamed(x_ref, wt_ref, b_ref, o_ref, acc_ref):
    """x:(tm,tk)  wt:(tk,Lp) streamed per k-step  b:(1,Lp) f32  o:(tm,Lp)."""
    k = pl.program_id(1)

    @pl.when(k == 0)
    def _():
        acc_ref[...] = jnp.zeros_like(acc_ref)

    acc_ref[...] += jnp.dot(x_ref[...], wt_ref[...],
                            preferred_element_type=jnp.float32)

    @pl.when(k == pl.num_programs(1) - 1)
    def _():
        _logsoftmax_epilogue(acc_ref, b_ref, o_ref)


def _bow_kernel_resident(x_ref, wt_ref, b_ref, o_ref, acc_ref, *, tk):
    """Same, but wt:(Vp,Lp) is VMEM-resident (constant index_map -> one DMA)."""
    k = pl.program_id(1)

    @pl.when(k == 0)
    def _():
        acc_ref[...] = jnp.zeros_like(acc_ref)

    start = pl.multiple_of(k * tk, tk)
    acc_ref[...] += jnp.dot(x_ref[...], wt_ref[pl.ds(start, tk), :],
                            preferred_element_type=jnp.float32)

    @pl.when(k == pl.num_programs(1) - 1)
    def _():
        _logsoftmax_epilogue(acc_ref, b_ref, o_ref)


# ---------------------------------------------------------------------------
# Wrapper
# ---------------------------------------------------------------------------
def _select_tk(V, tk, comp_itemsize):
    """Pick a 128-aligned reduction tile; even the k-steps so vocab padding is tiny."""
    v_min = _round_up(V, 128)
    if tk is None:
        tk = 8192 if comp_itemsize == 1 else 4096       # bigger tiles -> fewer grid steps
    tk = _round_up(min(int(tk), v_min), 128)
    nk = pl.cdiv(v_min, tk)
    return _round_up(pl.cdiv(v_min, nk), 128)


def _prepare_weights(weight, bias, *, tk, compute_dtype):
    """One-time prep: weight [L,V] -> transposed/padded wt_p [Vp,Lp]; bias -> [1,Lp] f32."""
    L, V = weight.shape
    Lp = _round_up(L, 128)
    Vp = _round_up(V, tk)
    wt = weight.astype(compute_dtype).T                 # [V, L]; no in-kernel transpose
    if (Vp, Lp) != (V, L):
        wt = jnp.pad(wt, ((0, Vp - V), (0, Lp - L)))    # zero pad: no dot contribution
    b = bias.astype(jnp.float32).reshape(1, L)
    if Lp != L:
        # padded label columns get a huge negative bias -> exp underflows to exactly 0
        b = jnp.pad(b, ((0, 0), (0, Lp - L)), constant_values=-1e30)
    return wt, b


@functools.partial(
    jax.jit,
    static_argnames=("L", "tm", "tk", "compute_dtype", "weight_resident"))
def _bow_apply(bow_vec, wt_p, b_p, *, L, tm, tk, compute_dtype, weight_resident):
    B, V = bow_vec.shape
    Vp, Lp = wt_p.shape
    out_dtype = bow_vec.dtype
    comp_isz = jnp.dtype(compute_dtype).itemsize
    out_isz = jnp.dtype(out_dtype).itemsize

    # --- batch tiling: rows pack 8 (f32) / 16 (bf16) / 32 (int8) per vreg sublane
    row_align = max(8, 32 // comp_isz)
    tm_req = 512 if tm is None else max(int(tm), row_align)
    # v7x megacore: guarantee >= 2 batch tiles on the "parallel" axis when B allows.
    if B > row_align:
        tm_cap = _round_up(pl.cdiv(B, 2), row_align)
    else:
        tm_cap = _round_up(B, row_align)
    tm_eff = _round_up(min(tm_req, tm_cap), row_align)
    Bp = _round_up(B, tm_eff)

    grid = (Bp // tm_eff, Vp // tk)

    # --- cast / pad x only when needed (avoid extra HBM read+write of the big stream)
    x = bow_vec if bow_vec.dtype == compute_dtype else bow_vec.astype(compute_dtype)
    if (Bp, Vp) != (B, V):
        x = jnp.pad(x, ((0, Bp - B), (0, Vp - V)))

    # --- VMEM budget & resident-weight decision (BlockSpec buffers are double-buffered)
    wt_resident_alloc = 2 * Vp * Lp * comp_isz          # constant index -> 1 DMA, 2 bufs
    wt_streamed_alloc = 2 * tk * Lp * comp_isz
    if weight_resident is None:
        weight_resident = wt_resident_alloc <= (16 << 20)
    x_alloc = 2 * tm_eff * tk * comp_isz
    o_alloc = 2 * tm_eff * Lp * out_isz
    acc_alloc = tm_eff * Lp * 4
    total_vmem = (x_alloc + o_alloc + acc_alloc + 2 * Lp * 4
                  + (wt_resident_alloc if weight_resident else wt_streamed_alloc))
    # v5e scoped default is 16 MiB -> set the limit to the real footprint (+headroom),
    # capped well below v7x's 64 MiB physical VMEM.
    vmem_limit = int(min(max(total_vmem + (2 << 20), 20 << 20), 48 << 20))

    if weight_resident:
        kernel = functools.partial(_bow_kernel_resident, tk=tk)
        wt_spec = pl.BlockSpec((Vp, Lp), lambda i, k: (0, 0))   # resident: DMA'd once
        wt_bytes_hbm = Vp * Lp * comp_isz
    else:
        kernel = _bow_kernel_streamed
        wt_spec = pl.BlockSpec((tk, Lp), lambda i, k: (k, 0))   # re-streamed per batch tile
        wt_bytes_hbm = grid[0] * Vp * Lp * comp_isz

    cost = pl.CostEstimate(
        flops=2 * Bp * Vp * Lp,
        transcendentals=Bp * Lp,
        bytes_accessed=Bp * Vp * comp_isz + wt_bytes_hbm + Bp * Lp * out_isz)

    out = pl.pallas_call(
        kernel,
        out_shape=jax.ShapeDtypeStruct((Bp, Lp), out_dtype),
        grid_spec=pltpu.PrefetchScalarGridSpec(
            num_scalar_prefetch=0,
            grid=grid,
            in_specs=[
                pl.BlockSpec((tm_eff, tk), lambda i, k: (i, k)),   # x tile
                wt_spec,                                           # weights
                pl.BlockSpec((1, Lp), lambda i, k: (0, 0)),        # bias (f32)
            ],
            out_specs=pl.BlockSpec((tm_eff, Lp), lambda i, k: (i, 0)),
            scratch_shapes=[pltpu.VMEM((tm_eff, Lp), jnp.float32)],
        ),
        compiler_params=pltpu.CompilerParams(
            dimension_semantics=("parallel", "arbitrary"),
            vmem_limit_bytes=vmem_limit,
        ),
        cost_estimate=cost,
    )(x, wt_p, b_p)

    return out[:B, :L]


def make_bow_classifier(weight, bias, *, tm=None, tk=None,
                        compute_dtype=jnp.bfloat16, weight_resident=None):
    """Prep the weights once (transpose/pad/cast, done eagerly) and return forward(x).

    Use this for repeated inference with fixed weights: the per-call path then only
    streams `bow_vec`, hoisting the weight preprocessing off the bandwidth-bound op.
    """
    L, V = weight.shape
    comp_isz = jnp.dtype(compute_dtype).itemsize
    tk_eff = _select_tk(V, tk, comp_isz)
    wt_p, b_p = _prepare_weights(weight, bias, tk=tk_eff, compute_dtype=compute_dtype)

    def forward(bow_vec, offsets=None):      # second arg unused, mirrors torch signature
        del offsets
        return _bow_apply(bow_vec, wt_p, b_p, L=L, tm=tm, tk=tk_eff,
                          compute_dtype=compute_dtype,
                          weight_resident=weight_resident)

    return forward


def bow_classifier_forward(bow_vec, weight, bias, *, tm=None, tk=None,
                           compute_dtype=jnp.bfloat16, weight_resident=None):
    """One-shot convenience wrapper (re-preps the weights each call)."""
    fwd = make_bow_classifier(weight, bias, tm=tm, tk=tk,
                              compute_dtype=compute_dtype,
                              weight_resident=weight_resident)
    return fwd(bow_vec)


def reference_forward(bow_vec, weight, bias):
    logits = bow_vec @ weight.T + bias
    return jax.nn.log_softmax(logits, axis=1)


if __name__ == "__main__":
    key = jax.random.PRNGKey(0)
    k_x, k_w, k_b, k_x2, k_w2, k_b2 = jax.random.split(key, 6)

    # --- small shapes matching the module's toy usage -----------------------
    num_labels, vocab_size, batch = 4, 32, 2
    bound = 1.0 / (vocab_size ** 0.5)
    weight = jax.random.uniform(k_w, (num_labels, vocab_size), jnp.float32,
                                minval=-bound, maxval=bound)
    bias = jax.random.uniform(k_b, (num_labels,), jnp.float32,
                              minval=-bound, maxval=bound)
    bow_vec = jax.random.randint(k_x, (batch, vocab_size), 0, 5).astype(jnp.float32)

    # exact check with f32 compute
    out_f32 = bow_classifier_forward(bow_vec, weight, bias,
                                     compute_dtype=jnp.float32)
    jax.block_until_ready(out_f32)
    ref = reference_forward(bow_vec, weight, bias)
    assert out_f32.shape == (batch, num_labels)
    assert jnp.allclose(out_f32, ref, atol=1e-5, rtol=1e-5)

    # default path (bf16 compute) vs reference on bf16-rounded inputs
    out_def = bow_classifier_forward(bow_vec, weight, bias)
    jax.block_until_ready(out_def)
    ref_bf16 = reference_forward(
        bow_vec.astype(jnp.bfloat16).astype(jnp.float32),
        weight.astype(jnp.bfloat16).astype(jnp.float32), bias)
    assert out_def.shape == (batch, num_labels)
    assert jnp.allclose(out_def, ref_bf16, atol=2e-2, rtol=2e-2)

    # --- larger, unaligned shapes: batch tiling, vocab reduction, label padding,
    #     hoisted weight prep, resident AND streamed weight paths -------------
    L2, V2, B2 = 5, 5000, 300
    bound2 = 1.0 / (V2 ** 0.5)
    w2 = jax.random.uniform(k_w2, (L2, V2), jnp.float32, minval=-bound2, maxval=bound2)
    b2 = jax.random.uniform(k_b2, (L2,), jnp.float32, minval=-bound2, maxval=bound2)
    x2 = jax.random.randint(k_x2, (B2, V2), 0, 5).astype(jnp.float32)

    ref2_f32 = reference_forward(x2, w2, b2)
    ref2_bf16 = reference_forward(
        x2.astype(jnp.bfloat16).astype(jnp.float32),
        w2.astype(jnp.bfloat16).astype(jnp.float32), b2)

    # hoisted prep (factory) + default bf16 compute, resident weight (auto)
    clf = make_bow_classifier(w2, b2)
    out2 = clf(x2, None)
    jax.block_until_ready(out2)
    assert out2.shape == (B2, L2)
    assert jnp.allclose(out2, ref2_bf16, atol=2e-2, rtol=2e-2)

    # streamed-weight fallback path (as used when the vocab is too big for VMEM)
    out2_stream = bow_classifier_forward(x2, w2, b2, tk=1024,
                                         weight_resident=False)
    jax.block_until_ready(out2_stream)
    assert jnp.allclose(out2_stream, ref2_bf16, atol=2e-2, rtol=2e-2)

    # f32 compute path on the large case for a tighter numerical check
    out2_f32 = bow_classifier_forward(x2, w2, b2, compute_dtype=jnp.float32,
                                      tm=64, tk=2048)
    jax.block_until_ready(out2_f32)
    assert jnp.allclose(out2_f32, ref2_f32, atol=1e-4, rtol=1e-4)

    print("KERNEL_OK")
</pallas_src>

<mosaic_0001>
module attributes {stable_mosaic.version = 11 : i64} {
  func.func @_bow_kernel_resident(%arg0: i32, %arg1: i32, %arg2: memref<8x128xf32, #tpu.memory_space<vmem>>, %arg3: memref<128x128xf32, #tpu.memory_space<vmem>>, %arg4: memref<1x128xf32, #tpu.memory_space<vmem>>, %arg5: memref<8x128xf32, #tpu.memory_space<vmem>>, %arg6: memref<8x128xf32, #tpu.memory_space<vmem>>) attributes {dimension_semantics = [#tpu.dimension_semantics<parallel>, #tpu.dimension_semantics<arbitrary>], iteration_bounds = array<i64: 1, 1>, scalar_prefetch = 0 : i64, scratch_operands = 1 : i64, tpu.core_type = #tpu.core_type<tc>, window_params = [{transform_indices = @transform_0, window_bounds = array<i64: 8, 128>}, {pipeline_mode = #tpu.pipeline_mode<synchronous>, transform_indices = @transform_1, window_bounds = array<i64: 128, 128>}, {pipeline_mode = #tpu.pipeline_mode<synchronous>, transform_indices = @transform_2, window_bounds = array<i64: 1, 128>}, {transform_indices = @transform_3, window_bounds = array<i64: 8, 128>}]} {
    %c0_i32 = arith.constant 0 : i32
    %0 = arith.cmpi eq, %arg1, %c0_i32 : i32
    %1 = arith.extui %0 : i1 to i32
    %c0_i32_0 = arith.constant 0 : i32
    %2 = arith.cmpi ne, %1, %c0_i32_0 : i32
    scf.if %2 {
      %cst_9 = arith.constant 0.000000e+00 : f32
      %15 = vector.broadcast %cst_9 : f32 to vector<8x128xf32>
      %c0_10 = arith.constant 0 : index
      %c0_11 = arith.constant 0 : index
      %16 = vector.load %arg6[%c0_10, %c0_11] : memref<8x128xf32, #tpu.memory_space<vmem>>, vector<8x128xf32>
      tpu.vector_store %arg6[%c0_10, %c0_11], %15 {strides = array<i32>} : memref<8x128xf32, #tpu.memory_space<vmem>>, vector<8x128xf32>,
    } else {
    }
    %c128_i32 = arith.constant 128 : i32
    %3 = arith.muli %arg1, %c128_i32 : i32
    %4 = tpu.assume_multiple %3, 128 : i32
    %c0 = arith.constant 0 : index
    %c0_1 = arith.constant 0 : index
    %5 = vector.load %arg6[%c0, %c0_1] : memref<8x128xf32, #tpu.memory_space<vmem>>, vector<8x128xf32>
    %c0_2 = arith.constant 0 : index
    %c0_3 = arith.constant 0 : index
    %6 = vector.load %arg2[%c0_2, %c0_3] : memref<8x128xf32, #tpu.memory_space<vmem>>, vector<8x128xf32>
    %7 = arith.index_cast %4 : i32 to index
    %c0_4 = arith.constant 0 : index
    %8 = vector.load %arg3[%7, %c0_4] : memref<128x128xf32, #tpu.memory_space<vmem>>, vector<128x128xf32>
    %cst = arith.constant dense<0.000000e+00> : vector<8x128xf32>
    %9 = tpu.matmul %6, %8, %cst {dimension_numbers = #tpu.dot_dimension_numbers<[1], [0], [0], [1], [0, 0, 1, 1], [], []>} : vector<8x128xf32>, vector<128x128xf32>, vector<8x128xf32> -> vector<8x128xf32>
    %10 = arith.addf %5, %9 : vector<8x128xf32>
    %c0_5 = arith.constant 0 : index
    %c0_6 = arith.constant 0 : index
    %11 = vector.load %arg6[%c0_5, %c0_6] : memref<8x128xf32, #tpu.memory_space<vmem>>, vector<8x128xf32>
    tpu.vector_store %arg6[%c0_5, %c0_6], %10 {strides = array<i32>} : memref<8x128xf32, #tpu.memory_space<vmem>>, vector<8x128xf32>,
    %c0_i32_7 = arith.constant 0 : i32
    %12 = arith.cmpi eq, %arg1, %c0_i32_7 : i32
    %13 = arith.extui %12 : i1 to i32
    %c0_i32_8 = arith.constant 0 : i32
    %14 = arith.cmpi ne, %13, %c0_i32_8 : i32
    scf.if %14 {
      %c0_9 = arith.constant 0 : index
      %c0_10 = arith.constant 0 : index
      %15 = vector.load %arg6[%c0_9, %c0_10] : memref<8x128xf32, #tpu.memory_space<vmem>>, vector<8x128xf32>
      %c0_11 = arith.constant 0 : index
      %c0_12 = arith.constant 0 : index
      %16 = vector.load %arg4[%c0_11, %c0_12] : memref<1x128xf32, #tpu.memory_space<vmem>>, vector<1x128xf32>
      %17 = vector.broadcast %16 : vector<1x128xf32> to vector<8x128xf32>
      %18 = arith.addf %15, %17 : vector<8x128xf32>
      %cst_13 = arith.constant dense<0xFF800000> : vector<8xf32>
      %19 = vector.multi_reduction <maximumf>, %18, %cst_13 [1] : vector<8x128xf32> to vector<8xf32>
      %20 = vector.shape_cast %19 : vector<8xf32> to vector<8x1xf32>
      %21 = vector.broadcast %20 : vector<8x1xf32> to vector<8x128xf32>
      %22 = arith.subf %18, %21 : vector<8x128xf32>
      %23 = math.exp %22 : vector<8x128xf32>
      %cst_14 = arith.constant dense<0.000000e+00> : vector<8xf32>
      %24 = vector.multi_reduction <add>, %23, %cst_14 [1] : vector<8x128xf32> to vector<8xf32>
      %25 = vector.shape_cast %24 : vector<8xf32> to vector<8x1xf32>
      %26 = math.log %25 : vector<8x1xf32>
      %27 = vector.broadcast %26 : vector<8x1xf32> to vector<8x128xf32>
      %28 = arith.subf %22, %27 : vector<8x128xf32>
      %c0_15 = arith.constant 0 : index
      %c0_16 = arith.constant 0 : index
      %29 = vector.load %arg5[%c0_15, %c0_16] : memref<8x128xf32, #tpu.memory_space<vmem>>, vector<8x128xf32>
      tpu.vector_store %arg5[%c0_15, %c0_16], %28 {strides = array<i32>} : memref<8x128xf32, #tpu.memory_space<vmem>>, vector<8x128xf32>,
    } else {
    }
    return
  }
  func.func @transform_0(%arg0: i32, %arg1: i32) -> (i32, i32) {
    %c0_i32 = arith.constant 0 : i32
    return %arg0, %arg1 : i32, i32
  }
  func.func @transform_1(%arg0: i32, %arg1: i32) -> (i32, i32) {
    %c0_i32 = arith.constant 0 : i32
    %c0_i32_0 = arith.constant 0 : i32
    %c0_i32_1 = arith.constant 0 : i32
    return %c0_i32, %c0_i32_0 : i32, i32
  }
  func.func @transform_2(%arg0: i32, %arg1: i32) -> (i32, i32) {
    %c0_i32 = arith.constant 0 : i32
    %c0_i32_0 = arith.constant 0 : i32
    %c0_i32_1 = arith.constant 0 : i32
    return %c0_i32, %c0_i32_0 : i32, i32
  }
  func.func @transform_3(%arg0: i32, %arg1: i32) -> (i32, i32) {
    %c0_i32 = arith.constant 0 : i32
    %c0_i32_0 = arith.constant 0 : i32
    return %arg0, %c0_i32 : i32, i32
  }
}

</mosaic_0001>

<bundles_post_ra>
// kernel: _bow_apply.1
= control target key start
LH: loop header
LB: loop body
LE: loop exit
PB: predicated region body
PF: predicated region fallthrough
CT: control target
= control target key end

     0   :  { %8 = vsyncpa [#allocation4], 0  ;;  %s136_s15 = smov [#allocation3]   ;;  %s137_s17 = smov 128   ;;  %s171_s0 = inlined_call_operand.vmem [shape: f32[8,128], index: 0, kind: input, shape index: {}]   ;;  %s172_s1 = inlined_call_operand.hbm [shape: f32[128,128], index: 1, kind: input, shape index: {}]   ;;  %s173_s2 = inlined_call_operand.vmem [shape: f32[1,128], index: 2, kind: input, shape index: {}]   ;;  %s174_s3 = inlined_call_operand.vmem [shape: f32[8,128], index: 3, kind: output, shape index: {}]  }
   0x1   :  { %s15_s14 = sshll.u32 %s172_s1, 4  ;;  %s17_s16 = sshll.u32 %s136_s15, 4  ;;  %s16_s14 = int_to_ptr.hbm [resolvable:$true] %s15_s14  ;;  %s18_s16 = int_to_ptr.vmem [resolvable:$true] %s17_s16 }
   0x2   :  { %s138_s18 = smov 8  }
   0x3   :  { %23 = dma.hbm_to_vmem [thread:$0]  %s16_s14, 2048, %s18_s16, [#allocation4], %s137_s17, %s137_s17, %s138_s18  }
   0x4   :  { %134 = dma.done.wait [#allocation4], 2048  }
   0x5   :  { %135 = vsyncadd [#allocation4], 4294965248  ;;  %v54_v0 = vld [vmem:[#allocation3 + $0x78] sm:$0xff]  ;;  %v53_v1 = vld [vmem:[#allocation3 + $0x70] sm:$0xff] }
   0x6   :  { %55 = vmatpush.msra.mxu0 %v54_v0  ;;  %v52_v2 = vld [vmem:[#allocation3 + $0x68] sm:$0xff]  ;;  %v51_v3 = vld [vmem:[#allocation3 + $0x60] sm:$0xff]  ;;  %v50_v4 = vld [vmem:[#allocation3 + $0x58] sm:$0xff] }
   0x7   :  { %v49_v5 = vld [vmem:[#allocation3 + $0x50] sm:$0xff]  ;;  %v48_v6 = vld [vmem:[#allocation3 + $0x48] sm:$0xff]  ;;  %v47_v7 = vld [vmem:[#allocation3 + $0x40] sm:$0xff] }
   0x8   :  { %56 = vmatpush.msra.mxu0 %v53_v1  ;;  %v46_v8 = vld [vmem:[#allocation3 + $0x38] sm:$0xff]  ;;  %v45_v9 = vld [vmem:[#allocation3 + $0x30] sm:$0xff]  ;;  %v44_v10 = vld [vmem:[#allocation3 + $0x28] sm:$0xff] }
   0x9   :  { %v43_v11 = vld [vmem:[#allocation3 + $0x20] sm:$0xff]  ;;  %v42_v12 = vld [vmem:[#allocation3 + $0x18] sm:$0xff]  ;;  %v41_v13 = vld [vmem:[#allocation3 + $0x10] sm:$0xff] }
   0xa   :  { %57 = vmatpush.msra.mxu0 %v52_v2  ;;  %v40_v14 = vld [vmem:[#allocation3 + $0x8] sm:$0xff]  ;;  %v39_v15 = vld [vmem:[#allocation3] sm:$0xff] }
   0xb   :  { %v37_v16 = vld [vmem:[%s171_s0] sm:$0xff] }
   0xc   :  { %58 = vmatpush.msra.mxu0 %v51_v3  ;;  %v105_v17 = vld [vmem:[%s173_s2] ss:$0 sm:$0xff] }
   0xe   :  { %59 = vmatpush.msra.mxu0 %v50_v4 }
  0x10   :  { %60 = vmatpush.msra.mxu0 %v49_v5 }
  0x12   :  { %61 = vmatpush.msra.mxu0 %v48_v6 }
  0x14   :  { %62 = vmatpush.msra.mxu0 %v47_v7 }
  0x16   :  { %63 = vmatpush.msra.mxu0 %v46_v8 }
  0x18   :  { %64 = vmatpush.msra.mxu0 %v45_v9 }
  0x1a   :  { %65 = vmatpush.msra.mxu0 %v44_v10 }
  0x1c   :  { %66 = vmatpush.msra.mxu0 %v43_v11 }
  0x1e   :  { %67 = vmatpush.msra.mxu0 %v42_v12 }
  0x20   :  { %68 = vmatpush.msra.mxu0 %v41_v13 }
  0x22   :  { %69 = vmatpush.msra.mxu0 %v40_v14 }
  0x24   :  { %70 = vmatpush.msra.mxu0 %v39_v15 }
  0x25   :  { %71 = vmatmul.f32.vlgmr.msra.gmra.mxu0 %v37_v16 }
  0xa2   :  { %v72_v18 = vpop.f32.mrf.mxu0 }
  0xa3   :  { %v85_v19 = vadd.f32 %v105_v17, %v72_v18 }
  0xa5   :  { %86 = vmax.xlane.f32.xlu0 %v85_v19 }
 0x118   :  { %v87_v20 = vpop.xlane.xlu0 %86 }
 0x119   :  { %v88_v21 = vsub.f32 %v85_v19, %v87_v20 }
 0x11b   :  { %v89_v22 = vmul.f32 1.442695, %v88_v21 }
 0x11d   :  { %106 = vpow2.f32 %v89_v22 }
 0x123   :  { %v107_v23 = vpop.eup %106 }
 0x124   :  { %91 = vadd.xlane.f32.xlu0 %v107_v23 }
 0x197   :  { %v92_v24 = vpop.xlane.xlu0 %91 }
 0x198   :  { %108 = vlog2.f32 %v92_v24 }
 0x19e   :  { %v109_v25 = vpop.eup %108 }
 0x19f   :  { %v94_v26 = vmul.f32 0.6931472, %v109_v25 }
 0x1a1   :  { %v95_v27 = vsub.f32 %v88_v21, %v94_v26 }
 0x1a3   :  { %96 = vst [vmem:[%s174_s3] sm:$0xff] %v95_v27 }
 0x1a4   :  { %101 = vsyncpa [#allocation4], 1 }

</bundles_post_ra>
